<compile_context>
chip_gen: v7x
topology: tpu7x:2x2x1
jax: 0.10.0
libtpu: 0.0.40
codegen_flags: <defaults>
</compile_context>

<pallas_src>
import jax
import jax.numpy as jnp
from jax.experimental import pallas as pl
from jax.experimental.pallas import tpu as pltpu

_LANE = 128
_SUBLANE = 8
_VMEM_CAP = 64 << 20   # v7x has 64 MiB VMEM per TC; stay under it everywhere.


def _round_up(x, m):
    return (x + m - 1) // m * m


def _leaky_relu(x, slope=0.2):
    return jnp.where(x >= 0, x, slope * x)


def encoder_kernel(x_ref, w1_ref, b1_ref, w2_ref, b2_ref, wp_ref, bp_ref, out_ref):
    """One batch tile; all (padded) feature dims resident in VMEM.

    x_ref  : [TB, Dp]
    w1_ref : [Dp, Hp]   b1_ref : [1, Hp]
    w2_ref : [Hp, Hp]   b2_ref : [1, Hp]
    wp_ref : [Hp, Np]   bp_ref : [1, Np]     (fused [Wm | Wv] projection)
    out_ref: [TB, Np]                        (fused [mean | log_var], lane-dense)
    """
    h = jnp.dot(x_ref[...], w1_ref[...], preferred_element_type=jnp.float32)
    h = _leaky_relu(h + b1_ref[...])

    h = jnp.dot(h, w2_ref[...], preferred_element_type=jnp.float32)
    h = _leaky_relu(h + b2_ref[...])

    out_ref[...] = (jnp.dot(h, wp_ref[...], preferred_element_type=jnp.float32)
                    + bp_ref[...]).astype(out_ref.dtype)


def _vmem_bytes(tb, dp, hp, np_):
    # Double-buffered batch-tiled tensors + resident params (2 bufs allocated
    # by the pipeline even though the constant-index DMA only fires once).
    return 4 * (2 * tb * dp + 2 * tb * np_
                + 2 * (dp * hp + hp * hp + hp * np_ + 2 * hp + np_)) + (4 << 20)


def encoder_forward(x, params):
    """params: dict with w1,b1,w2,b2,wm,bm,wv,bv (weights already [in, out])."""
    B, D_in = x.shape
    H = params["w1"].shape[1]
    L = params["wm"].shape[1]

    # ---- Fuse mean / log_var projections into one lane-dense matmul. ----
    wp = jnp.concatenate([params["wm"], params["wv"]], axis=1)   # [H, 2L]
    bp = jnp.concatenate([params["bm"], params["bv"]], axis=1)   # [1, 2L]

    # ---- Pad feature dims to full 128-lane tiles (exact: zeros are inert). ----
    Dp = _round_up(D_in, _LANE)
    Hp = _round_up(H, _LANE)
    Np = _round_up(2 * L, _LANE)

    # ---- Batch tile: biggest {512,256,128,B8} that fits the VMEM budget. ----
    B8 = _round_up(B, _SUBLANE)
    TB = B8
    for cand in (512, 256, 128):
        if B8 >= cand and _vmem_bytes(cand, Dp, Hp, Np) <= _VMEM_CAP:
            TB = cand
            break
    Bp = _round_up(B8, TB)

    x_p = jnp.pad(x, ((0, Bp - B), (0, Dp - D_in)))
    w1_p = jnp.pad(params["w1"], ((0, Dp - D_in), (0, Hp - H)))
    b1_p = jnp.pad(params["b1"], ((0, 0), (0, Hp - H)))
    w2_p = jnp.pad(params["w2"], ((0, Hp - H), (0, Hp - H)))
    b2_p = jnp.pad(params["b2"], ((0, 0), (0, Hp - H)))
    wp_p = jnp.pad(wp, ((0, Hp - H), (0, Np - 2 * L)))
    bp_p = jnp.pad(bp, ((0, 0), (0, Np - 2 * L)))

    grid = (Bp // TB,)
    resident = lambda i: (0, 0)   # weights/biases stay put across the grid
    batched = lambda i: (i, 0)    # x / fused output tile over the batch

    vmem_bytes = min(max(_vmem_bytes(TB, Dp, Hp, Np), 8 << 20), _VMEM_CAP)

    flops = 2 * Bp * (Dp * Hp + Hp * Hp + Hp * Np)
    bytes_accessed = 4 * (Bp * Dp + Bp * Np
                          + Dp * Hp + Hp * Hp + Hp * Np + 2 * Hp + Np)

    out_p = pl.pallas_call(
        encoder_kernel,
        out_shape=jax.ShapeDtypeStruct((Bp, Np), jnp.float32),
        grid=grid,
        in_specs=[
            pl.BlockSpec((TB, Dp), batched),
            pl.BlockSpec((Dp, Hp), resident),
            pl.BlockSpec((1, Hp), resident),
            pl.BlockSpec((Hp, Hp), resident),
            pl.BlockSpec((1, Hp), resident),
            pl.BlockSpec((Hp, Np), resident),
            pl.BlockSpec((1, Np), resident),
        ],
        out_specs=pl.BlockSpec((TB, Np), batched),
        compiler_params=pltpu.CompilerParams(
            dimension_semantics=("parallel",),
            vmem_limit_bytes=vmem_bytes,
        ),
        cost_estimate=pl.CostEstimate(
            flops=flops, transcendentals=0, bytes_accessed=bytes_accessed),
    )(x_p, w1_p, b1_p, w2_p, b2_p, wp_p, bp_p)

    mean = out_p[:B, :L]
    log_var = out_p[:B, L:2 * L]
    return mean, log_var


def init_params(key, input_dim, hidden_dim, latent_dim):
    """Deterministic init mimicking PyTorch nn.Linear default:
    U(-1/sqrt(fan_in), 1/sqrt(fan_in)). Weights stored as [in, out]."""
    def linear(k, fan_in, fan_out):
        kw, kb = jax.random.split(k)
        bound = 1.0 / jnp.sqrt(float(fan_in))
        w = jax.random.uniform(kw, (fan_in, fan_out), jnp.float32, -bound, bound)
        b = jax.random.uniform(kb, (1, fan_out), jnp.float32, -bound, bound)
        return w, b

    k1, k2, k3, k4 = jax.random.split(key, 4)
    w1, b1 = linear(k1, input_dim, hidden_dim)
    w2, b2 = linear(k2, hidden_dim, hidden_dim)
    wm, bm = linear(k3, hidden_dim, latent_dim)
    wv, bv = linear(k4, hidden_dim, latent_dim)
    return dict(w1=w1, b1=b1, w2=w2, b2=b2, wm=wm, bm=bm, wv=wv, bv=bv)


def encoder_ref(x, p):
    """Pure-JAX reference for correctness checking."""
    h = x @ p["w1"] + p["b1"]
    h = jnp.where(h >= 0, h, 0.2 * h)
    h = h @ p["w2"] + p["b2"]
    h = jnp.where(h >= 0, h, 0.2 * h)
    return h @ p["wm"] + p["bm"], h @ p["wv"] + p["bv"]


if __name__ == "__main__":
    # Small shapes consistent with an MLP VAE encoder.
    batch, input_dim, hidden_dim, latent_dim = 8, 64, 32, 16

    key = jax.random.PRNGKey(0)
    k_x, k_p = jax.random.split(key)

    x = jax.random.normal(k_x, (batch, input_dim), jnp.float32)
    params = init_params(k_p, input_dim, hidden_dim, latent_dim)

    mean, log_var = jax.jit(encoder_forward)(x, params)
    jax.block_until_ready((mean, log_var))

    # Sanity check against pure-JAX reference.
    mean_ref, logvar_ref = encoder_ref(x, params)
    assert mean.shape == (batch, latent_dim)
    assert log_var.shape == (batch, latent_dim)
    assert jnp.allclose(mean, mean_ref, atol=1e-5, rtol=1e-5)
    assert jnp.allclose(log_var, logvar_ref, atol=1e-5, rtol=1e-5)

    print("KERNEL_OK")
</pallas_src>

<mosaic_0001>
module attributes {stable_mosaic.version = 11 : i64} {
  func.func @encoder_kernel(%arg0: i32, %arg1: memref<8x128xf32, #tpu.memory_space<vmem>>, %arg2: memref<128x128xf32, #tpu.memory_space<vmem>>, %arg3: memref<1x128xf32, #tpu.memory_space<vmem>>, %arg4: memref<128x128xf32, #tpu.memory_space<vmem>>, %arg5: memref<1x128xf32, #tpu.memory_space<vmem>>, %arg6: memref<128x128xf32, #tpu.memory_space<vmem>>, %arg7: memref<1x128xf32, #tpu.memory_space<vmem>>, %arg8: memref<8x128xf32, #tpu.memory_space<vmem>>) attributes {dimension_semantics = [#tpu.dimension_semantics<parallel>], iteration_bounds = array<i64: 1>, scalar_prefetch = 0 : i64, scratch_operands = 0 : i64, tpu.core_type = #tpu.core_type<tc>, window_params = [{transform_indices = @transform_0, window_bounds = array<i64: 8, 128>}, {pipeline_mode = #tpu.pipeline_mode<synchronous>, transform_indices = @transform_1, window_bounds = array<i64: 128, 128>}, {pipeline_mode = #tpu.pipeline_mode<synchronous>, transform_indices = @transform_2, window_bounds = array<i64: 1, 128>}, {pipeline_mode = #tpu.pipeline_mode<synchronous>, transform_indices = @transform_3, window_bounds = array<i64: 128, 128>}, {pipeline_mode = #tpu.pipeline_mode<synchronous>, transform_indices = @transform_4, window_bounds = array<i64: 1, 128>}, {pipeline_mode = #tpu.pipeline_mode<synchronous>, transform_indices = @transform_5, window_bounds = array<i64: 128, 128>}, {pipeline_mode = #tpu.pipeline_mode<synchronous>, transform_indices = @transform_6, window_bounds = array<i64: 1, 128>}, {transform_indices = @transform_7, window_bounds = array<i64: 8, 128>}]} {
    %c0 = arith.constant 0 : index
    %c0_0 = arith.constant 0 : index
    %0 = vector.load %arg1[%c0, %c0_0] : memref<8x128xf32, #tpu.memory_space<vmem>>, vector<8x128xf32>
    %c0_1 = arith.constant 0 : index
    %c0_2 = arith.constant 0 : index
    %1 = vector.load %arg2[%c0_1, %c0_2] : memref<128x128xf32, #tpu.memory_space<vmem>>, vector<128x128xf32>
    %cst = arith.constant dense<0.000000e+00> : vector<8x128xf32>
    %2 = tpu.matmul %0, %1, %cst {dimension_numbers = #tpu.dot_dimension_numbers<[1], [0], [0], [1], [0, 0, 1, 1], [], []>} : vector<8x128xf32>, vector<128x128xf32>, vector<8x128xf32> -> vector<8x128xf32>
    %c0_3 = arith.constant 0 : index
    %c0_4 = arith.constant 0 : index
    %3 = vector.load %arg3[%c0_3, %c0_4] : memref<1x128xf32, #tpu.memory_space<vmem>>, vector<1x128xf32>
    %4 = vector.broadcast %3 : vector<1x128xf32> to vector<8x128xf32>
    %5 = arith.addf %2, %4 : vector<8x128xf32>
    %cst_5 = arith.constant 0.000000e+00 : f32
    %6 = vector.broadcast %cst_5 : f32 to vector<8x128xf32>
    %7 = arith.cmpf oge, %5, %6 : vector<8x128xf32>
    %cst_6 = arith.constant 2.000000e-01 : f32
    %8 = vector.broadcast %cst_6 : f32 to vector<8x128xf32>
    %9 = arith.mulf %8, %5 : vector<8x128xf32>
    %10 = arith.select %7, %5, %9 : vector<8x128xi1>, vector<8x128xf32>
    %c0_7 = arith.constant 0 : index
    %c0_8 = arith.constant 0 : index
    %11 = vector.load %arg4[%c0_7, %c0_8] : memref<128x128xf32, #tpu.memory_space<vmem>>, vector<128x128xf32>
    %cst_9 = arith.constant dense<0.000000e+00> : vector<8x128xf32>
    %12 = tpu.matmul %10, %11, %cst_9 {dimension_numbers = #tpu.dot_dimension_numbers<[1], [0], [0], [1], [0, 0, 1, 1], [], []>} : vector<8x128xf32>, vector<128x128xf32>, vector<8x128xf32> -> vector<8x128xf32>
    %c0_10 = arith.constant 0 : index
    %c0_11 = arith.constant 0 : index
    %13 = vector.load %arg5[%c0_10, %c0_11] : memref<1x128xf32, #tpu.memory_space<vmem>>, vector<1x128xf32>
    %14 = vector.broadcast %13 : vector<1x128xf32> to vector<8x128xf32>
    %15 = arith.addf %12, %14 : vector<8x128xf32>
    %cst_12 = arith.constant 0.000000e+00 : f32
    %16 = vector.broadcast %cst_12 : f32 to vector<8x128xf32>
    %17 = arith.cmpf oge, %15, %16 : vector<8x128xf32>
    %cst_13 = arith.constant 2.000000e-01 : f32
    %18 = vector.broadcast %cst_13 : f32 to vector<8x128xf32>
    %19 = arith.mulf %18, %15 : vector<8x128xf32>
    %20 = arith.select %17, %15, %19 : vector<8x128xi1>, vector<8x128xf32>
    %c0_14 = arith.constant 0 : index
    %c0_15 = arith.constant 0 : index
    %21 = vector.load %arg6[%c0_14, %c0_15] : memref<128x128xf32, #tpu.memory_space<vmem>>, vector<128x128xf32>
    %cst_16 = arith.constant dense<0.000000e+00> : vector<8x128xf32>
    %22 = tpu.matmul %20, %21, %cst_16 {dimension_numbers = #tpu.dot_dimension_numbers<[1], [0], [0], [1], [0, 0, 1, 1], [], []>} : vector<8x128xf32>, vector<128x128xf32>, vector<8x128xf32> -> vector<8x128xf32>
    %c0_17 = arith.constant 0 : index
    %c0_18 = arith.constant 0 : index
    %23 = vector.load %arg7[%c0_17, %c0_18] : memref<1x128xf32, #tpu.memory_space<vmem>>, vector<1x128xf32>
    %24 = vector.broadcast %23 : vector<1x128xf32> to vector<8x128xf32>
    %25 = arith.addf %22, %24 : vector<8x128xf32>
    %c0_19 = arith.constant 0 : index
    %c0_20 = arith.constant 0 : index
    %26 = vector.load %arg8[%c0_19, %c0_20] : memref<8x128xf32, #tpu.memory_space<vmem>>, vector<8x128xf32>
    tpu.vector_store %arg8[%c0_19, %c0_20], %25 {strides = array<i32>} : memref<8x128xf32, #tpu.memory_space<vmem>>, vector<8x128xf32>,
    return
  }
  func.func @transform_0(%arg0: i32) -> (i32, i32) {
    %c0_i32 = arith.constant 0 : i32
    %c0_i32_0 = arith.constant 0 : i32
    return %arg0, %c0_i32 : i32, i32
  }
  func.func @transform_1(%arg0: i32) -> (i32, i32) {
    %c0_i32 = arith.constant 0 : i32
    %c0_i32_0 = arith.constant 0 : i32
    %c0_i32_1 = arith.constant 0 : i32
    return %c0_i32, %c0_i32_0 : i32, i32
  }
  func.func @transform_2(%arg0: i32) -> (i32, i32) {
    %c0_i32 = arith.constant 0 : i32
    %c0_i32_0 = arith.constant 0 : i32
    %c0_i32_1 = arith.constant 0 : i32
    return %c0_i32, %c0_i32_0 : i32, i32
  }
  func.func @transform_3(%arg0: i32) -> (i32, i32) {
    %c0_i32 = arith.constant 0 : i32
    %c0_i32_0 = arith.constant 0 : i32
    %c0_i32_1 = arith.constant 0 : i32
    return %c0_i32, %c0_i32_0 : i32, i32
  }
  func.func @transform_4(%arg0: i32) -> (i32, i32) {
    %c0_i32 = arith.constant 0 : i32
    %c0_i32_0 = arith.constant 0 : i32
    %c0_i32_1 = arith.constant 0 : i32
    return %c0_i32, %c0_i32_0 : i32, i32
  }
  func.func @transform_5(%arg0: i32) -> (i32, i32) {
    %c0_i32 = arith.constant 0 : i32
    %c0_i32_0 = arith.constant 0 : i32
    %c0_i32_1 = arith.constant 0 : i32
    return %c0_i32, %c0_i32_0 : i32, i32
  }
  func.func @transform_6(%arg0: i32) -> (i32, i32) {
    %c0_i32 = arith.constant 0 : i32
    %c0_i32_0 = arith.constant 0 : i32
    %c0_i32_1 = arith.constant 0 : i32
    return %c0_i32, %c0_i32_0 : i32, i32
  }
  func.func @transform_7(%arg0: i32) -> (i32, i32) {
    %c0_i32 = arith.constant 0 : i32
    %c0_i32_0 = arith.constant 0 : i32
    return %arg0, %c0_i32 : i32, i32
  }
}

</mosaic_0001>

<bundles_post_ra>
// kernel: encoder_forward.1
= control target key start
LH: loop header
LB: loop body
LE: loop exit
PB: predicated region body
PF: predicated region fallthrough
CT: control target
= control target key end

     0   :  { %v551_v0 = vmov 0.0|0.0   ;;  %vm552_vm0 = vmmov 0   ;;  %v553_v4 = vmov 0.0   ;;  %s783_s1 = inlined_call_operand.vmem [shape: f32[128,128], index: 1, kind: input, shape index: {}]   ;;  %s784_s3 = inlined_call_operand.vmem [shape: f32[128,128], index: 3, kind: input, shape index: {}]   ;;  %s785_s0 = inlined_call_operand.vmem [shape: f32[8,128], index: 0, kind: input, shape index: {}]   ;;  %s786_s5 = inlined_call_operand.vmem [shape: f32[128,128], index: 5, kind: input, shape index: {}]   ;;  %s787_s2 = inlined_call_operand.vmem [shape: f32[1,128], index: 2, kind: input, shape index: {}]   ;;  %s788_s4 = inlined_call_operand.vmem [shape: f32[1,128], index: 4, kind: input, shape index: {}]   ;;  %s789_s6 = inlined_call_operand.vmem [shape: f32[1,128], index: 6, kind: input, shape index: {}]   ;;  %s790_s7 = inlined_call_operand.vmem [shape: f32[8,128], index: 7, kind: output, shape index: {}]  }
   0x1   :  { %476 = vmatprep.subr.bf16.mxu0 %v551_v0  ;;  %v27_v1 = vld [vmem:[%s783_s1] sm:$0xff]  ;;  %v28_v2 = vld [vmem:[%s783_s1 + $0x8] sm:$0xff]  ;;  %v29_v3 = vld [vmem:[%s783_s1 + $0x10] sm:$0xff]  ;;  %403 = vmatprep.mubr.msk.f32.mxu0 %vm552_vm0, %v553_v4 }
   0x2   :  { %v477_v5 = vpack.c.bf16 %v28_v2, %v27_v1  ;;  %v30_v6 = vld [vmem:[%s783_s1 + $0x18] sm:$0xff]  ;;  %500 = vmatprep.subr.bf16.mxu1 %v551_v0  ;;  %438 = vmatprep.mubr.msk.f32.mxu1 %vm552_vm0, %v553_v4  ;;  %v31_v8 = vld [vmem:[%s783_s1 + $0x20] sm:$0xff]  ;;  %v32_v9 = vld [vmem:[%s783_s1 + $0x28] sm:$0xff] }
   0x3   :  { %v480_v7 = vpack.c.bf16 %v30_v6, %v29_v3  ;;  %v123_v10 = vld [vmem:[%s784_s3] sm:$0xff]  ;;  %v124_v11 = vld [vmem:[%s784_s3 + $0x8] sm:$0xff]  ;;  %v125_v12 = vld [vmem:[%s784_s3 + $0x10] sm:$0xff]  ;;  %v483_v14 = vpack.c.bf16 %v32_v9, %v31_v8 }
   0x4   :  { %478 = vmatpush3.bf16.msra.mxu0 %v477_v5  ;;  %v126_v13 = vld [vmem:[%s784_s3 + $0x18] sm:$0xff]  ;;  %v501_v15 = vpack.c.bf16 %v124_v11, %v123_v10  ;;  %v33_v16 = vld [vmem:[%s783_s1 + $0x30] sm:$0xff]  ;;  %v127_v19 = vld [vmem:[%s784_s3 + $0x20] sm:$0xff] }
   0x5   :  { %479 = vmatprep.subr.bf16.mxu0 %v551_v0  ;;  %v34_v17 = vld [vmem:[%s783_s1 + $0x38] sm:$0xff]  ;;  %v504_v18 = vpack.c.bf16 %v126_v13, %v125_v12  ;;  %v128_v20 = vld [vmem:[%s784_s3 + $0x28] sm:$0xff]  ;;  %v35_v22 = vld [vmem:[%s783_s1 + $0x40] sm:$0xff] }
   0x6   :  { %502 = vmatpush3.bf16.msra.mxu1 %v501_v15  ;;  %v486_v21 = vpack.c.bf16 %v34_v17, %v33_v16  ;;  %v36_v23 = vld [vmem:[%s783_s1 + $0x48] sm:$0xff]  ;;  %v507_v24 = vpack.c.bf16 %v128_v20, %v127_v19  ;;  %v129_v25 = vld [vmem:[%s784_s3 + $0x30] sm:$0xff]  ;;  %v130_v26 = vld [vmem:[%s784_s3 + $0x38] sm:$0xff] }
   0x7   :  { %503 = vmatprep.subr.bf16.mxu1 %v551_v0  ;;  %v489_v27 = vpack.c.bf16 %v36_v23, %v35_v22  ;;  %v37_v28 = vld [vmem:[%s783_s1 + $0x50] sm:$0xff]  ;;  %v38_v29 = vld [vmem:[%s783_s1 + $0x58] sm:$0xff]  ;;  %v510_v30 = vpack.c.bf16 %v130_v26, %v129_v25  ;;  %v131_v31 = vld [vmem:[%s784_s3 + $0x40] sm:$0xff] }
   0x8   :  { %481 = vmatpush3.bf16.msra.mxu0 %v480_v7  ;;  %v132_v32 = vld [vmem:[%s784_s3 + $0x48] sm:$0xff]  ;;  %v492_v33 = vpack.c.bf16 %v38_v29, %v37_v28  ;;  %v39_v34 = vld [vmem:[%s783_s1 + $0x60] sm:$0xff]  ;;  %v133_v37 = vld [vmem:[%s784_s3 + $0x50] sm:$0xff] }
   0x9   :  { %482 = vmatprep.subr.bf16.mxu0 %v551_v0  ;;  %v40_v35 = vld [vmem:[%s783_s1 + $0x68] sm:$0xff]  ;;  %v513_v36 = vpack.c.bf16 %v132_v32, %v131_v31  ;;  %v134_v38 = vld [vmem:[%s784_s3 + $0x58] sm:$0xff]  ;;  %v41_v40 = vld [vmem:[%s783_s1 + $0x70] sm:$0xff] }
   0xa   :  { %505 = vmatpush3.bf16.msra.mxu1 %v504_v18  ;;  %v495_v39 = vpack.c.bf16 %v40_v35, %v39_v34  ;;  %v42_v41 = vld [vmem:[%s783_s1 + $0x78] sm:$0xff]  ;;  %v516_v42 = vpack.c.bf16 %v134_v38, %v133_v37  ;;  %v135_v43 = vld [vmem:[%s784_s3 + $0x60] sm:$0xff]  ;;  %v136_v44 = vld [vmem:[%s784_s3 + $0x68] sm:$0xff] }
   0xb   :  { %506 = vmatprep.subr.bf16.mxu1 %v551_v0  ;;  %v498_v45 = vpack.c.bf16 %v42_v41, %v41_v40  ;;  %v519_v46 = vpack.c.bf16 %v136_v44, %v135_v43  ;;  %v26_v47 = vld [vmem:[%s785_s0] sm:$0xff]  ;;  %v137_v48 = vld [vmem:[%s784_s3 + $0x70] sm:$0xff]  ;;  %v138_v49 = vld [vmem:[%s784_s3 + $0x78] sm:$0xff] }
   0xc   :  { %484 = vmatpush3.bf16.msra.mxu0 %v483_v14  ;;  %v522_v50 = vpack.c.bf16 %v138_v49, %v137_v48  ;;  %v219_v51 = vld [vmem:[%s786_s5] sm:$0xff]  ;;  %v220_v52 = vld [vmem:[%s786_s5 + $0x8] sm:$0xff]  ;;  %v221_v53 = vld [vmem:[%s786_s5 + $0x10] sm:$0xff] }
   0xd   :  { %485 = vmatprep.subr.bf16.mxu0 %v551_v0  ;;  %v525_v54 = vpack.c.bf16 %v220_v52, %v219_v51  ;;  %v222_v55 = vld [vmem:[%s786_s5 + $0x18] sm:$0xff]  ;;  %v223_v57 = vld [vmem:[%s786_s5 + $0x20] sm:$0xff]  ;;  %v224_v58 = vld [vmem:[%s786_s5 + $0x28] sm:$0xff] }
   0xe   :  { %508 = vmatpush3.bf16.msra.mxu1 %v507_v24  ;;  %v528_v56 = vpack.c.bf16 %v222_v55, %v221_v53  ;;  %v531_v59 = vpack.c.bf16 %v224_v58, %v223_v57  ;;  %v225_v60 = vld [vmem:[%s786_s5 + $0x30] sm:$0xff]  ;;  %v226_v61 = vld [vmem:[%s786_s5 + $0x38] sm:$0xff]  ;;  %v227_v63 = vld [vmem:[%s786_s5 + $0x40] sm:$0xff] }
   0xf   :  { %509 = vmatprep.subr.bf16.mxu1 %v551_v0  ;;  %v534_v62 = vpack.c.bf16 %v226_v61, %v225_v60  ;;  %v228_v1 = vld [vmem:[%s786_s5 + $0x48] sm:$0xff]  ;;  %v229_v3 = vld [vmem:[%s786_s5 + $0x50] sm:$0xff]  ;;  %v231_v6 = vld [vmem:[%s786_s5 + $0x60] sm:$0xff] }
  0x10   :  { %487 = vmatpush3.bf16.msra.mxu0 %v486_v21  ;;  %v537_v2 = vpack.c.bf16 %v228_v1, %v227_v63  ;;  %v232_v7 = vld [vmem:[%s786_s5 + $0x68] sm:$0xff]  ;;  %v317_v9 = vld [vmem:[%s787_s2] ss:$0 sm:$0xff]  ;;  %v233_v15 = vld [vmem:[%s786_s5 + $0x70] sm:$0xff] }
  0x11   :  { %488 = vmatprep.subr.bf16.mxu0 %v551_v0  ;;  %v543_v8 = vpack.c.bf16 %v232_v7, %v231_v6  ;;  %v234_v16 = vld [vmem:[%s786_s5 + $0x78] sm:$0xff]  ;;  %v318_v17 = vld [vmem:[%s788_s4] ss:$0 sm:$0xff] }
  0x12   :  { %511 = vmatpush3.bf16.msra.mxu1 %v510_v30  ;;  %v319_v23 = vld [vmem:[%s789_s6] ss:$0 sm:$0xff] }
  0x13   :  { %512 = vmatprep.subr.bf16.mxu1 %v551_v0 }
  0x14   :  { %490 = vmatpush3.bf16.msra.mxu0 %v489_v27 }
  0x15   :  { %491 = vmatprep.subr.bf16.mxu0 %v551_v0 }
  0x16   :  { %514 = vmatpush3.bf16.msra.mxu1 %v513_v36 }
  0x17   :  { %515 = vmatprep.subr.bf16.mxu1 %v551_v0 }
  0x18   :  { %493 = vmatpush3.bf16.msra.mxu0 %v492_v33 }
  0x19   :  { %494 = vmatprep.subr.bf16.mxu0 %v551_v0 }
  0x1a   :  { %517 = vmatpush3.bf16.msra.mxu1 %v516_v42 }
  0x1b   :  { %518 = vmatprep.subr.bf16.mxu1 %v551_v0 }
  0x1c   :  { %496 = vmatpush3.bf16.msra.mxu0 %v495_v39 }
  0x1d   :  { %497 = vmatprep.subr.bf16.mxu0 %v551_v0 }
  0x1e   :  { %520 = vmatpush3.bf16.msra.mxu1 %v519_v46 }
  0x1f   :  { %521 = vmatprep.subr.bf16.mxu1 %v551_v0 }
  0x20   :  { %499 = vmatpush3.bf16.msra.mxu0 %v498_v45 }
  0x21   :  { %524 = vmatprep.subr.bf16.mxu0 %v551_v0 }
  0x22   :  { %523 = vmatpush3.bf16.msra.mxu1 %v522_v50 }
  0x23   :  { %404 = vmatmul.mubr.f32.vlgmr.msra.gmra.mrb[0].mxu0 %v26_v47 }
  0x24   :  { %473 = vmatprep.mubr.msk.f32.mxu0 %vm552_vm0, %v553_v4  ;;  %526 = vmatpush3.bf16.msra.mxu0 %v525_v54  ;;  %v230_v4 = vld [vmem:[%s786_s5 + $0x58] sm:$0xff] }
  0x25   :  { %527 = vmatprep.subr.bf16.mxu0 %v551_v0  ;;  %v540_v5 = vpack.c.bf16 %v230_v4, %v229_v3 }
  0x28   :  { %529 = vmatpush3.bf16.msra.mxu0 %v528_v56 }
  0x29   :  { %530 = vmatprep.subr.bf16.mxu0 %v551_v0 }
  0x2c   :  { %532 = vmatpush3.bf16.msra.mxu0 %v531_v59 }
  0x2d   :  { %533 = vmatprep.subr.bf16.mxu0 %v551_v0 }
  0x30   :  { %535 = vmatpush3.bf16.msra.mxu0 %v534_v62 }
  0x31   :  { %536 = vmatprep.subr.bf16.mxu0 %v551_v0 }
  0x34   :  { %538 = vmatpush3.bf16.msra.mxu0 %v537_v2 }
  0x35   :  { %539 = vmatprep.subr.bf16.mxu0 %v551_v0 }
  0x38   :  { %541 = vmatpush3.bf16.msra.mxu0 %v540_v5 }
  0x39   :  { %542 = vmatprep.subr.bf16.mxu0 %v551_v0 }
  0x3c   :  { %544 = vmatpush3.bf16.msra.mxu0 %v543_v8 }
  0x3d   :  { %545 = vmatprep.subr.bf16.mxu0 %v551_v0  ;;  %v546_v0 = vpack.c.bf16 %v234_v16, %v233_v15 }
  0x40   :  { %547 = vmatpush3.bf16.msra.mxu0 %v546_v0 }
  0xf6   :  { %v116_v10 = vpop.f32.mrb[0].mxu0 }
  0xf7   :  { %v117_v11 = vadd.f32 %v317_v9, %v116_v10  ;;  %v405_v12 = vpop.f32.mrb[1].mxu0 }
  0xf9   :  { %v121_v13 = vmul.f32 0.2, %v117_v11  ;;  %vm120_vm1 = vcmp.ge.f32.partialorder %v117_v11, 0.0 }
  0xfb   :  { %v122_v14 = vsel %vm120_vm1, %v117_v11, %v121_v13 }
  0xfc   :  { %439 = vmatmul.mubr.f32.vlgmr.msra.gmra.mrb[0].mxu1 %v122_v14 }
 0x1cf   :  { %v212_v18 = vpop.f32.mrb[0].mxu1 }
 0x1d0   :  { %v213_v19 = vadd.f32 %v318_v17, %v212_v18  ;;  %v440_v20 = vpop.f32.mrb[1].mxu1 }
 0x1d2   :  { %vm216_vm2 = vcmp.ge.f32.partialorder %v213_v19, 0.0  ;;  %v217_v21 = vmul.f32 0.2, %v213_v19 }
 0x1d4   :  { %v218_v22 = vsel %vm216_vm2, %v213_v19, %v217_v21 }
 0x1d5   :  { %474 = vmatmul.mubr.f32.vlgmr.msra.gmra.mrb[2].mxu0 %v218_v22 }
 0x2a8   :  { %v308_v24 = vpop.f32.mrb[2].mxu0 }
 0x2a9   :  { %v309_v25 = vadd.f32 %v319_v23, %v308_v24  ;;  %v475_v26 = vpop.f32.mrb[3].mxu0 }
 0x2ab   :  { %312 = vst [vmem:[%s790_s7] sm:$0xff] %v309_v25 }

</bundles_post_ra>
